<compile_context>
chip_gen: v7x
topology: tpu7x:2x2x1
jax: 0.10.0
libtpu: 0.0.40
codegen_flags: <defaults>
</compile_context>

<pallas_src>
import functools

import jax
import jax.numpy as jnp
from jax.experimental import pallas as pl
from jax.experimental.pallas import tpu as pltpu


def _mmd_kernel(s_ref, t_ref, o_ref, *, batch, dim, kernel_mul, kernel_num,
                fix_sigma):
    s = s_ref[...].astype(jnp.float32)
    t = t_ref[...].astype(jnp.float32)

    # Faithful to the reference code: source scaled by its own range, target
    # scaled by the range of the *already scaled* source.
    rng_s = jnp.max(s) - jnp.min(s)
    u = s / rng_s
    rng_u = jnp.max(u) - jnp.min(u)
    v = t / rng_u

    # Common per-feature mean; subtracting it leaves every pairwise difference
    # (hence every L2 entry) unchanged but conditions the norm expansion.
    m = (jnp.sum(u, axis=0, keepdims=True) +
         jnp.sum(v, axis=0, keepdims=True)) * (1.0 / (2 * batch))
    uc = u - m
    vc = v - m

    a_sq = jnp.sum(uc * uc, keepdims=True)        # (1,1)  sum_i ||u_i||^2
    b_sq = jnp.sum(vc * vc, keepdims=True)        # (1,1)  sum_j ||v_j||^2
    cu = jnp.sum(uc, axis=0, keepdims=True)       # (1,D)  sum_i u_i
    cv = jnp.sum(vc, axis=0, keepdims=True)       # (1,D)  sum_j v_j
    p_uu = jnp.sum(cu * cu, keepdims=True)
    p_vv = jnp.sum(cv * cv, keepdims=True)
    p_uv = jnp.sum(cu * cv, keepdims=True)

    inv_d = 1.0 / dim
    s_xx = (2.0 * batch * a_sq - 2.0 * p_uu) * inv_d          # sum of XX block of L2
    s_yy = (2.0 * batch * b_sq - 2.0 * p_vv) * inv_d          # sum of YY block
    s_xy = (batch * a_sq + batch * b_sq - 2.0 * p_uv) * inv_d  # == sum of YX block

    n = 2 * batch
    if fix_sigma:  # static compile-time branch, same truthiness rule as torch
        bandwidth = jnp.full((1, 1), float(fix_sigma), jnp.float32)
    else:
        s_total = s_xx + s_yy + 2.0 * s_xy                    # sum over full N x N
        bandwidth = s_total * (1.0 / (n * n - n))
    bandwidth = bandwidth * (1.0 / (kernel_mul ** (kernel_num // 2)))

    # sum_i -L2/(bw*mul^i) == -L2 * (sum_i mul^-i) / bw
    coef = float(sum(kernel_mul ** (-i) for i in range(kernel_num)))
    s_signed = s_xx + s_yy - 2.0 * s_xy                       # XX + YY - XY - YX
    o_ref[...] = -(coef / bandwidth) * s_signed * (1.0 / (batch * batch))


def mmd_loss(source, target, *, kernel_mul=2.0, kernel_num=5, fix_sigma=None):
    """MMD loss matching MMD.forward(source, target) of the PyTorch module."""
    assert source.ndim == 2 and source.shape == target.shape, (
        "source/target must be 2-D [batch, features] with matching shapes")
    b, d = source.shape

    kernel = functools.partial(
        _mmd_kernel, batch=b, dim=d, kernel_mul=float(kernel_mul),
        kernel_num=int(kernel_num), fix_sigma=fix_sigma)

    bytes_in = (source.size * source.dtype.itemsize
                + target.size * target.dtype.itemsize)
    cost = pl.CostEstimate(flops=12 * b * d, transcendentals=0,
                           bytes_accessed=bytes_in + 4)

    # Whole arrays as single VMEM blocks (block_shape == array shape); typical
    # [batch, features] MMD inputs are far below the VMEM limit.
    out = pl.pallas_call(
        kernel,
        out_shape=jax.ShapeDtypeStruct((1, 1), jnp.float32),
        grid_spec=pltpu.PrefetchScalarGridSpec(
            num_scalar_prefetch=0,
            grid=(1,),
            in_specs=[
                pl.BlockSpec((b, d), lambda i: (0, 0)),
                pl.BlockSpec((b, d), lambda i: (0, 0)),
            ],
            out_specs=pl.BlockSpec((1, 1), lambda i: (0, 0)),
        ),
        compiler_params=pltpu.CompilerParams(
            dimension_semantics=("arbitrary",)),
        cost_estimate=cost,
    )(source, target)
    return out[0, 0]


def _mmd_reference(source, target, kernel_mul=2.0, kernel_num=5, fix_sigma=None):
    """Literal JAX transcription of the PyTorch module's forward pass."""
    b = source.shape[0]
    src = source.astype(jnp.float32)
    tgt = target.astype(jnp.float32)
    src = src.reshape(src.shape[0], src.shape[1]) / (src.max() - src.min())
    tgt = tgt.reshape(src.shape[0], src.shape[1]) / (src.max() - src.min())
    n_samples = 2 * b
    total = jnp.concatenate([src, tgt], axis=0)
    l2 = jnp.mean((total[None, :, :] - total[:, None, :]) ** 2, axis=2)
    if fix_sigma:
        bandwidth = jnp.float32(fix_sigma)
    else:
        bandwidth = jnp.sum(l2) / (n_samples ** 2 - n_samples)
    bandwidth = bandwidth / (kernel_mul ** (kernel_num // 2))
    kernels = sum(-l2 / (bandwidth * kernel_mul ** i) for i in range(kernel_num))
    xx = kernels[:b, :b]
    yy = kernels[b:, b:]
    xy = kernels[:b, b:]
    yx = kernels[b:, :b]
    return jnp.mean(xx + yy - xy - yx)


if __name__ == "__main__":
    key = jax.random.PRNGKey(0)
    k1, k2 = jax.random.split(key)
    # 2-D [batch, features] inputs, as the module's .view(B, D) implies.
    source = jax.random.normal(k1, (8, 32), dtype=jnp.float32)
    target = jax.random.normal(k2, (8, 32), dtype=jnp.float32) + 0.5

    loss = jax.block_until_ready(mmd_loss(source, target))

    ref = _mmd_reference(source, target)
    assert jnp.allclose(loss, ref, rtol=1e-3, atol=1e-5), (loss, ref)

    print("KERNEL_OK")
</pallas_src>

<mosaic_0001>
module attributes {stable_mosaic.version = 11 : i64} {
  func.func @_mmd_kernel(%arg0: i32, %arg1: memref<8x32xf32, #tpu.memory_space<vmem>>, %arg2: memref<8x32xf32, #tpu.memory_space<vmem>>, %arg3: memref<1x1xf32, #tpu.memory_space<vmem>>) attributes {dimension_semantics = [#tpu.dimension_semantics<arbitrary>], iteration_bounds = array<i64: 1>, scalar_prefetch = 0 : i64, scratch_operands = 0 : i64, tpu.core_type = #tpu.core_type<tc>, window_params = [{pipeline_mode = #tpu.pipeline_mode<synchronous>, transform_indices = @transform_0, window_bounds = array<i64: 8, 32>}, {pipeline_mode = #tpu.pipeline_mode<synchronous>, transform_indices = @transform_1, window_bounds = array<i64: 8, 32>}, {pipeline_mode = #tpu.pipeline_mode<synchronous>, transform_indices = @transform_2, window_bounds = array<i64: 1, 1>}]} {
    %c0 = arith.constant 0 : index
    %c0_0 = arith.constant 0 : index
    %0 = vector.load %arg1[%c0, %c0_0] : memref<8x32xf32, #tpu.memory_space<vmem>>, vector<8x32xf32>
    %c0_1 = arith.constant 0 : index
    %c0_2 = arith.constant 0 : index
    %1 = vector.load %arg2[%c0_1, %c0_2] : memref<8x32xf32, #tpu.memory_space<vmem>>, vector<8x32xf32>
    %2 = vector.shape_cast %0 : vector<8x32xf32> to vector<1x8x32xf32>
    %cst = arith.constant dense<0xFF800000> : vector<1xf32>
    %3 = vector.multi_reduction <maximumf>, %2, %cst [1, 2] : vector<1x8x32xf32> to vector<1xf32>
    %4 = vector.shape_cast %3 : vector<1xf32> to vector<1x1x1xf32>
    %5 = vector.extract %4[0, 0, 0] : f32 from vector<1x1x1xf32>
    %6 = vector.shape_cast %0 : vector<8x32xf32> to vector<1x8x32xf32>
    %cst_3 = arith.constant dense<0x7F800000> : vector<1xf32>
    %7 = vector.multi_reduction <minimumf>, %6, %cst_3 [1, 2] : vector<1x8x32xf32> to vector<1xf32>
    %8 = vector.shape_cast %7 : vector<1xf32> to vector<1x1x1xf32>
    %9 = vector.extract %8[0, 0, 0] : f32 from vector<1x1x1xf32>
    %10 = arith.subf %5, %9 : f32
    %11 = vector.broadcast %10 : f32 to vector<8x32xf32>
    %12 = arith.divf %0, %11 : vector<8x32xf32>
    %13 = vector.shape_cast %12 : vector<8x32xf32> to vector<1x8x32xf32>
    %cst_4 = arith.constant dense<0xFF800000> : vector<1xf32>
    %14 = vector.multi_reduction <maximumf>, %13, %cst_4 [1, 2] : vector<1x8x32xf32> to vector<1xf32>
    %15 = vector.shape_cast %14 : vector<1xf32> to vector<1x1x1xf32>
    %16 = vector.extract %15[0, 0, 0] : f32 from vector<1x1x1xf32>
    %17 = vector.shape_cast %12 : vector<8x32xf32> to vector<1x8x32xf32>
    %cst_5 = arith.constant dense<0x7F800000> : vector<1xf32>
    %18 = vector.multi_reduction <minimumf>, %17, %cst_5 [1, 2] : vector<1x8x32xf32> to vector<1xf32>
    %19 = vector.shape_cast %18 : vector<1xf32> to vector<1x1x1xf32>
    %20 = vector.extract %19[0, 0, 0] : f32 from vector<1x1x1xf32>
    %21 = arith.subf %16, %20 : f32
    %22 = vector.broadcast %21 : f32 to vector<8x32xf32>
    %23 = arith.divf %1, %22 : vector<8x32xf32>
    %cst_6 = arith.constant dense<0.000000e+00> : vector<32xf32>
    %24 = vector.multi_reduction <add>, %12, %cst_6 [0] : vector<8x32xf32> to vector<32xf32>
    %25 = vector.shape_cast %24 : vector<32xf32> to vector<1x32xf32>
    %cst_7 = arith.constant dense<0.000000e+00> : vector<32xf32>
    %26 = vector.multi_reduction <add>, %23, %cst_7 [0] : vector<8x32xf32> to vector<32xf32>
    %27 = vector.shape_cast %26 : vector<32xf32> to vector<1x32xf32>
    %28 = arith.addf %25, %27 : vector<1x32xf32>
    %cst_8 = arith.constant 6.250000e-02 : f32
    %29 = vector.broadcast %cst_8 : f32 to vector<1x32xf32>
    %30 = arith.mulf %28, %29 : vector<1x32xf32>
    %31 = vector.broadcast %30 : vector<1x32xf32> to vector<8x32xf32>
    %32 = arith.subf %12, %31 : vector<8x32xf32>
    %33 = vector.broadcast %30 : vector<1x32xf32> to vector<8x32xf32>
    %34 = arith.subf %23, %33 : vector<8x32xf32>
    %35 = arith.mulf %32, %32 : vector<8x32xf32>
    %36 = vector.shape_cast %35 : vector<8x32xf32> to vector<1x8x32xf32>
    %cst_9 = arith.constant dense<0.000000e+00> : vector<1xf32>
    %37 = vector.multi_reduction <add>, %36, %cst_9 [1, 2] : vector<1x8x32xf32> to vector<1xf32>
    %38 = vector.shape_cast %37 : vector<1xf32> to vector<1x1x1xf32>
    %39 = vector.extract %38[0, 0, 0] : f32 from vector<1x1x1xf32>
    %40 = vector.broadcast %39 : f32 to vector<1x1xf32>
    %41 = arith.mulf %34, %34 : vector<8x32xf32>
    %42 = vector.shape_cast %41 : vector<8x32xf32> to vector<1x8x32xf32>
    %cst_10 = arith.constant dense<0.000000e+00> : vector<1xf32>
    %43 = vector.multi_reduction <add>, %42, %cst_10 [1, 2] : vector<1x8x32xf32> to vector<1xf32>
    %44 = vector.shape_cast %43 : vector<1xf32> to vector<1x1x1xf32>
    %45 = vector.extract %44[0, 0, 0] : f32 from vector<1x1x1xf32>
    %46 = vector.broadcast %45 : f32 to vector<1x1xf32>
    %cst_11 = arith.constant dense<0.000000e+00> : vector<32xf32>
    %47 = vector.multi_reduction <add>, %32, %cst_11 [0] : vector<8x32xf32> to vector<32xf32>
    %48 = vector.shape_cast %47 : vector<32xf32> to vector<1x32xf32>
    %cst_12 = arith.constant dense<0.000000e+00> : vector<32xf32>
    %49 = vector.multi_reduction <add>, %34, %cst_12 [0] : vector<8x32xf32> to vector<32xf32>
    %50 = vector.shape_cast %49 : vector<32xf32> to vector<1x32xf32>
    %51 = arith.mulf %48, %48 : vector<1x32xf32>
    %52 = vector.shape_cast %51 : vector<1x32xf32> to vector<1x1x32xf32>
    %cst_13 = arith.constant dense<0.000000e+00> : vector<1xf32>
    %53 = vector.multi_reduction <add>, %52, %cst_13 [1, 2] : vector<1x1x32xf32> to vector<1xf32>
    %54 = vector.shape_cast %53 : vector<1xf32> to vector<1x1x1xf32>
    %55 = vector.extract %54[0, 0, 0] : f32 from vector<1x1x1xf32>
    %56 = vector.broadcast %55 : f32 to vector<1x1xf32>
    %57 = arith.mulf %50, %50 : vector<1x32xf32>
    %58 = vector.shape_cast %57 : vector<1x32xf32> to vector<1x1x32xf32>
    %cst_14 = arith.constant dense<0.000000e+00> : vector<1xf32>
    %59 = vector.multi_reduction <add>, %58, %cst_14 [1, 2] : vector<1x1x32xf32> to vector<1xf32>
    %60 = vector.shape_cast %59 : vector<1xf32> to vector<1x1x1xf32>
    %61 = vector.extract %60[0, 0, 0] : f32 from vector<1x1x1xf32>
    %62 = vector.broadcast %61 : f32 to vector<1x1xf32>
    %63 = arith.mulf %48, %50 : vector<1x32xf32>
    %64 = vector.shape_cast %63 : vector<1x32xf32> to vector<1x1x32xf32>
    %cst_15 = arith.constant dense<0.000000e+00> : vector<1xf32>
    %65 = vector.multi_reduction <add>, %64, %cst_15 [1, 2] : vector<1x1x32xf32> to vector<1xf32>
    %66 = vector.shape_cast %65 : vector<1xf32> to vector<1x1x1xf32>
    %67 = vector.extract %66[0, 0, 0] : f32 from vector<1x1x1xf32>
    %68 = vector.broadcast %67 : f32 to vector<1x1xf32>
    %cst_16 = arith.constant 1.600000e+01 : f32
    %69 = vector.broadcast %cst_16 : f32 to vector<1x1xf32>
    %70 = arith.mulf %69, %40 : vector<1x1xf32>
    %cst_17 = arith.constant 2.000000e+00 : f32
    %71 = vector.broadcast %cst_17 : f32 to vector<1x1xf32>
    %72 = arith.mulf %71, %56 : vector<1x1xf32>
    %73 = arith.subf %70, %72 : vector<1x1xf32>
    %cst_18 = arith.constant 3.125000e-02 : f32
    %74 = vector.broadcast %cst_18 : f32 to vector<1x1xf32>
    %75 = arith.mulf %73, %74 : vector<1x1xf32>
    %cst_19 = arith.constant 1.600000e+01 : f32
    %76 = vector.broadcast %cst_19 : f32 to vector<1x1xf32>
    %77 = arith.mulf %76, %46 : vector<1x1xf32>
    %cst_20 = arith.constant 2.000000e+00 : f32
    %78 = vector.broadcast %cst_20 : f32 to vector<1x1xf32>
    %79 = arith.mulf %78, %62 : vector<1x1xf32>
    %80 = arith.subf %77, %79 : vector<1x1xf32>
    %cst_21 = arith.constant 3.125000e-02 : f32
    %81 = vector.broadcast %cst_21 : f32 to vector<1x1xf32>
    %82 = arith.mulf %80, %81 : vector<1x1xf32>
    %cst_22 = arith.constant 8.000000e+00 : f32
    %83 = vector.broadcast %cst_22 : f32 to vector<1x1xf32>
    %84 = arith.mulf %83, %40 : vector<1x1xf32>
    %cst_23 = arith.constant 8.000000e+00 : f32
    %85 = vector.broadcast %cst_23 : f32 to vector<1x1xf32>
    %86 = arith.mulf %85, %46 : vector<1x1xf32>
    %87 = arith.addf %84, %86 : vector<1x1xf32>
    %cst_24 = arith.constant 2.000000e+00 : f32
    %88 = vector.broadcast %cst_24 : f32 to vector<1x1xf32>
    %89 = arith.mulf %88, %68 : vector<1x1xf32>
    %90 = arith.subf %87, %89 : vector<1x1xf32>
    %cst_25 = arith.constant 3.125000e-02 : f32
    %91 = vector.broadcast %cst_25 : f32 to vector<1x1xf32>
    %92 = arith.mulf %90, %91 : vector<1x1xf32>
    %93 = arith.addf %75, %82 : vector<1x1xf32>
    %cst_26 = arith.constant 2.000000e+00 : f32
    %94 = vector.broadcast %cst_26 : f32 to vector<1x1xf32>
    %95 = arith.mulf %94, %92 : vector<1x1xf32>
    %96 = arith.addf %93, %95 : vector<1x1xf32>
    %cst_27 = arith.constant 0.00416666688 : f32
    %97 = vector.broadcast %cst_27 : f32 to vector<1x1xf32>
    %98 = arith.mulf %96, %97 : vector<1x1xf32>
    %cst_28 = arith.constant 2.500000e-01 : f32
    %99 = vector.broadcast %cst_28 : f32 to vector<1x1xf32>
    %100 = arith.mulf %98, %99 : vector<1x1xf32>
    %101 = arith.addf %75, %82 : vector<1x1xf32>
    %cst_29 = arith.constant 2.000000e+00 : f32
    %102 = vector.broadcast %cst_29 : f32 to vector<1x1xf32>
    %103 = arith.mulf %102, %92 : vector<1x1xf32>
    %104 = arith.subf %101, %103 : vector<1x1xf32>
    %cst_30 = arith.constant 1.937500e+00 : f32
    %105 = vector.broadcast %cst_30 : f32 to vector<1x1xf32>
    %106 = arith.divf %105, %100 : vector<1x1xf32>
    %cst_31 = arith.constant 0.000000e+00 : f32
    %107 = vector.broadcast %cst_31 : f32 to vector<1x1xf32>
    %108 = arith.subf %107, %106 : vector<1x1xf32>
    %109 = arith.mulf %108, %104 : vector<1x1xf32>
    %cst_32 = arith.constant 1.562500e-02 : f32
    %110 = vector.broadcast %cst_32 : f32 to vector<1x1xf32>
    %111 = arith.mulf %109, %110 : vector<1x1xf32>
    %c0_33 = arith.constant 0 : index
    %c0_34 = arith.constant 0 : index
    %112 = vector.load %arg3[%c0_33, %c0_34] : memref<1x1xf32, #tpu.memory_space<vmem>>, vector<1x1xf32>
    tpu.vector_store %arg3[%c0_33, %c0_34], %111 {strides = array<i32>} : memref<1x1xf32, #tpu.memory_space<vmem>>, vector<1x1xf32>,
    return
  }
  func.func @transform_0(%arg0: i32) -> (i32, i32) {
    %c0_i32 = arith.constant 0 : i32
    %c0_i32_0 = arith.constant 0 : i32
    %c0_i32_1 = arith.constant 0 : i32
    return %c0_i32, %c0_i32_0 : i32, i32
  }
  func.func @transform_1(%arg0: i32) -> (i32, i32) {
    %c0_i32 = arith.constant 0 : i32
    %c0_i32_0 = arith.constant 0 : i32
    %c0_i32_1 = arith.constant 0 : i32
    return %c0_i32, %c0_i32_0 : i32, i32
  }
  func.func @transform_2(%arg0: i32) -> (i32, i32) {
    %c0_i32 = arith.constant 0 : i32
    %c0_i32_0 = arith.constant 0 : i32
    %c0_i32_1 = arith.constant 0 : i32
    return %c0_i32, %c0_i32_0 : i32, i32
  }
}

</mosaic_0001>

<bundles_post_ra>
// kernel: tpu_custom_call.1
= control target key start
LH: loop header
LB: loop body
LE: loop exit
PB: predicated region body
PF: predicated region fallthrough
CT: control target
= control target key end

     0   :  { %7 = vsyncpa [#allocation3], 0  ;;  %s386_s0 = inlined_call_operand.hbm [shape: f32[8,32], index: 0, kind: input, shape index: {}]   ;;  %s387_s1 = inlined_call_operand.hbm [shape: f32[8,32], index: 1, kind: input, shape index: {}]   ;;  %s388_s2 = inlined_call_operand.hbm [shape: f32[1,1], index: 2, kind: output, shape index: {}]  }
   0x1   :  { %8 = vsyncpa [#allocation6], 0 }
   0x2   :  { %9 = vsyncpa [#allocation4], 0  ;;  %s322_s9 = smov [#allocation2]   ;;  %s323_s11 = smov [#allocation5]  }
   0x3   :  { %s16_s10 = sshll.u32 %s322_s9, 4  ;;  %s26_s12 = sshll.u32 %s323_s11, 4  ;;  %s17_s10 = int_to_ptr.vmem [resolvable:$true] %s16_s10  ;;  %s27_s12 = int_to_ptr.vmem [resolvable:$true] %s26_s12 }
   0x4   :  { %s250_s15 = scalar_lea.hbm %s386_s0, 128 }
   0x5   :  { %p251_p0 = scmp.ne.s32.totalorder %s386_s0, %s250_s15  ;;  %p254_p1 = scmp.lt.u32.totalorder %s250_s15, %s386_s0 }
   0x7   :  { %p256_p2 = pnand %p254_p1, %p251_p0 }
   0x9   :  { %259 = shalt.err (!%p256_p2)
}
   0xa   :  { %s260_s20 = scalar_lea.vmem %s17_s10, 128  ;;  %p265_p4 = scmp.lt.s32.totalorder %s17_s10, %s17_s10 }
   0xb   :  { %p261_p3 = scmp.ne.s32.totalorder %s17_s10, %s260_s20  ;;  %p266_p5 = scmp.lt.s32.totalorder %s260_s20, %s260_s20 }
   0xd   :  { %p267_p6 = por %p266_p5, %p265_p4 }
   0xf   :  { %p268_p7 = pnand %p267_p6, %p261_p3 }
  0x11   :  { %271 = shalt.err (!%p268_p7)
}
  0x12   :  { %19 = dma.hbm_to_vmem [thread:$0]  %s386_s0, 128, %s17_s10, [#allocation3]  }
  0x13   :  { %s272_s25 = scalar_lea.hbm %s387_s1, 128 }
  0x14   :  { %p273_p8 = scmp.ne.s32.totalorder %s387_s1, %s272_s25  ;;  %p276_p9 = scmp.lt.u32.totalorder %s272_s25, %s387_s1 }
  0x16   :  { %p278_p10 = pnand %p276_p9, %p273_p8 }
  0x18   :  { %281 = shalt.err (!%p278_p10)
}
  0x19   :  { %s282_s30 = scalar_lea.vmem %s27_s12, 128  ;;  %p287_p12 = scmp.lt.s32.totalorder %s27_s12, %s27_s12 }
  0x1a   :  { %p283_p11 = scmp.ne.s32.totalorder %s27_s12, %s282_s30  ;;  %p288_p13 = scmp.lt.s32.totalorder %s282_s30, %s282_s30 }
  0x1c   :  { %p289_p0 = por %p288_p13, %p287_p12 }
  0x1e   :  { %p290_p1 = pnand %p289_p0, %p283_p11 }
  0x20   :  { %293 = shalt.err (!%p290_p1)
}
  0x21   :  { %29 = dma.hbm_to_vmem [thread:$0]  %s387_s1, 128, %s27_s12, [#allocation6]  }
  0x22   :  { %316 = dma.done.wait [#allocation3], 128  }
  0x23   :  { %317 = vsyncadd [#allocation3], 4294967168 }
  0x24   :  { %318 = dma.done.wait [#allocation6], 128  }
  0x25   :  { %319 = vsyncadd [#allocation6], 4294967168  ;;  %vm38_vm0 = vcmask 261120   ;;  %v36_v0 = vld [vmem:[#allocation2] sm:$0xff]  ;;  %v37_v39 = vld [vmem:[#allocation5] sm:$0xff]  ;;  %vm144_vm1 = vcmask 253952  }
  0x26   :  { %v39_v1 = vsel %vm38_vm0, %v36_v0, -inf  ;;  %v49_v2 = vsel %vm38_vm0, %v36_v0, inf  ;;  %s324_s14 = smov [#allocation7]   ;;  %vm205_vm2 = vcmask 0  }
  0x27   :  { %40 = vmax.xlane.f32.xlu0 %v39_v1  ;;  %s213_s15 = sshll.u32 %s324_s14, 4  ;;  %s214_s15 = int_to_ptr.vmem [resolvable:$true] %s213_s15 }
  0x28   :  { %s294_s16 = scalar_lea.vmem %s214_s15, 16  ;;  %s298_s17 = scalar_lea.vmem %s214_s15, 32 }
  0x29   :  { %p295_p2 = scmp.ne.s32.totalorder %s214_s15, %s294_s16  ;;  %p299_p3 = scmp.lt.s32.totalorder %s214_s15, %s214_s15 }
  0x2a   :  { %p300_p4 = scmp.lt.s32.totalorder %s298_s17, %s294_s16 }
  0x2b   :  { %50 = vmin.xlane.f32.xlu0 %v49_v2 }
  0x2c   :  { %p301_p5 = por %p300_p4, %p299_p3 }
  0x2e   :  { %p302_p6 = pnand %p301_p5, %p295_p2 }
  0xb4   :  { %v41_v3 = vpop.xlane.xlu0 %40 }
  0xb5   :  { %v42_v4 = vrot.slane %v41_v3, 4 }
  0xb7   :  { %v43_v5 = vmax.f32 %v41_v3, %v42_v4 }
  0xb8   :  { %v51_v6 = vpop.xlane.xlu0 %50 }
  0xb9   :  { %v44_v7 = vrot.slane %v43_v5, 2  ;;  %v52_v8 = vrot.slane %v51_v6, 4 }
  0xbb   :  { %v53_v9 = vmin.f32 %v51_v6, %v52_v8  ;;  %v45_v10 = vmax.f32 %v43_v5, %v44_v7 }
  0xbd   :  { %v54_v11 = vrot.slane %v53_v9, 2  ;;  %v46_v12 = vrot.slane %v45_v10, 1 }
  0xbf   :  { %v47_v13 = vmax.f32 %v45_v10, %v46_v12  ;;  %v55_v14 = vmin.f32 %v53_v9, %v54_v11 }
  0xc1   :  { %223 = vpush %v47_v13  ;;  %v56_v15 = vrot.slane %v55_v14, 1 }
  0xc3   :  { %v57_v16 = vmin.f32 %v55_v14, %v56_v15 }
  0xc5   :  { %225 = vpush %v57_v16 }
  0xf2   :  { %s224_s1 = spop %223 }
  0xf6   :  { %s226_s4 = spop %225 }
  0xf7   :  { %s59_s5 = ssub.f32 %s224_s1, %s226_s4 }
  0xf9   :  { %v60_v17 = vstv %s59_s5 }
  0xfa   :  { %244 = vrcp.f32 %v60_v17 }
 0x104   :  { %v245_v18 = vpop.eup %244 }
 0x105   :  { %v62_v19 = vmul.f32 %v245_v18, %v36_v0 }
 0x107   :  { %v63_v20 = vsel %vm38_vm0, %v62_v19, -inf  ;;  %v73_v21 = vsel %vm38_vm0, %v62_v19, inf  ;;  %v87_v37 = vsel %vm38_vm0, %v62_v19, 0.0 }
 0x108   :  { %64 = vmax.xlane.f32.xlu1 %v63_v20  ;;  %v88_v38 = vrot.slane %v87_v37, 4 }
 0x10a   :  { %v89_v40 = vadd.f32 %v88_v38, %v87_v37 }
 0x10c   :  { %74 = vmin.xlane.f32.xlu1 %v73_v21  ;;  %v90_v43 = vrot.slane %v89_v40, 2 }
 0x10e   :  { %v91_v46 = vadd.f32 %v90_v43, %v89_v40 }
 0x110   :  { %v92_v49 = vrot.slane %v91_v46, 1 }
 0x112   :  { %v93_v52 = vadd.f32 %v92_v49, %v91_v46 }
 0x195   :  { %v65_v22 = vpop.xlane.xlu1 %64 }
 0x196   :  { %v66_v23 = vrot.slane %v65_v22, 4 }
 0x198   :  { %v67_v24 = vmax.f32 %v65_v22, %v66_v23 }
 0x199   :  { %v75_v25 = vpop.xlane.xlu1 %74 }
 0x19a   :  { %v68_v26 = vrot.slane %v67_v24, 2  ;;  %v76_v27 = vrot.slane %v75_v25, 4 }
 0x19c   :  { %v77_v28 = vmin.f32 %v75_v25, %v76_v27  ;;  %v69_v29 = vmax.f32 %v67_v24, %v68_v26 }
 0x19e   :  { %v78_v30 = vrot.slane %v77_v28, 2  ;;  %v70_v31 = vrot.slane %v69_v29, 1 }
 0x1a0   :  { %v71_v32 = vmax.f32 %v69_v29, %v70_v31  ;;  %v79_v33 = vmin.f32 %v77_v28, %v78_v30 }
 0x1a2   :  { %227 = vpush %v71_v32  ;;  %v80_v34 = vrot.slane %v79_v33, 1 }
 0x1a4   :  { %v81_v35 = vmin.f32 %v79_v33, %v80_v34 }
 0x1a6   :  { %229 = vpush %v81_v35 }
 0x1d3   :  { %s228_s6 = spop %227 }
 0x1d7   :  { %s230_s7 = spop %229 }
 0x1d8   :  { %s83_s8 = ssub.f32 %s228_s6, %s230_s7 }
 0x1da   :  { %v84_v36 = vstv %s83_s8 }
 0x1db   :  { %246 = vrcp.f32 %v84_v36 }
 0x1e5   :  { %v247_v41 = vpop.eup %246 }
 0x1e6   :  { %v86_v42 = vmul.f32 %v247_v41, %v37_v39 }
 0x1e8   :  { %v94_v44 = vsel %vm38_vm0, %v86_v42, 0.0 }
 0x1e9   :  { %v95_v45 = vrot.slane %v94_v44, 4 }
 0x1eb   :  { %v96_v47 = vadd.f32 %v95_v45, %v94_v44 }
 0x1ed   :  { %v97_v48 = vrot.slane %v96_v47, 2 }
 0x1ef   :  { %v98_v50 = vadd.f32 %v97_v48, %v96_v47 }
 0x1f1   :  { %v99_v51 = vrot.slane %v98_v50, 1 }
 0x1f3   :  { %v100_v53 = vadd.f32 %v99_v51, %v98_v50 }
 0x1f5   :  { %v101_v54 = vadd.f32 %v100_v53, %v93_v52 }
 0x1f7   :  { %v102_v55 = vmul.f32 0.0625, %v101_v54 }
 0x1f9   :  { %v104_v56 = vsub.f32 %v86_v42, %v102_v55  ;;  %v103_v57 = vsub.f32 %v62_v19, %v102_v55 }
 0x1fb   :  { %v117_v58 = vmul.f32 %v104_v56, %v104_v56  ;;  %v136_v59 = vsel %vm38_vm0, %v104_v56, 0.0  ;;  %v105_v60 = vmul.f32 %v103_v57, %v103_v57  ;;  %v129_v61 = vsel %vm38_vm0, %v103_v57, 0.0 }
 0x1fc   :  { %v137_v62 = vrot.slane %v136_v59, 4  ;;  %v130_v63 = vrot.slane %v129_v61, 4 }
 0x1fd   :  { %v118_v0 = vsel %vm38_vm0, %v117_v58, 0.0  ;;  %v106_v1 = vsel %vm38_vm0, %v105_v60, 0.0 }
 0x1fe   :  { %v138_v2 = vadd.f32 %v137_v62, %v136_v59  ;;  %119 = vadd.xlane.f32.xlu1 %v118_v0  ;;  %v131_v3 = vadd.f32 %v130_v63, %v129_v61  ;;  %107 = vadd.xlane.f32.xlu0 %v106_v1 }
 0x200   :  { %v139_v4 = vrot.slane %v138_v2, 2  ;;  %v132_v5 = vrot.slane %v131_v3, 2 }
 0x202   :  { %v140_v6 = vadd.f32 %v139_v4, %v138_v2  ;;  %v133_v7 = vadd.f32 %v132_v5, %v131_v3 }
 0x204   :  { %v141_v8 = vrot.slane %v140_v6, 1  ;;  %v134_v9 = vrot.slane %v133_v7, 1 }
 0x206   :  { %v142_v10 = vadd.f32 %v141_v8, %v140_v6  ;;  %v135_v11 = vadd.f32 %v134_v9, %v133_v7 }
 0x208   :  { %v156_v12 = vmul.f32 %v142_v10, %v142_v10  ;;  %v143_v13 = vmul.f32 %v135_v11, %v135_v11  ;;  %v168_v16 = vmul.f32 %v142_v10, %v135_v11 }
 0x20a   :  { %v157_v14 = vsel %vm144_vm1, %v156_v12, 0.0  ;;  %v145_v15 = vsel %vm144_vm1, %v143_v13, 0.0  ;;  %v169_v17 = vsel %vm144_vm1, %v168_v16, 0.0 }
 0x20b   :  { %158 = vadd.xlane.f32.xlu1 %v157_v14  ;;  %146 = vadd.xlane.f32.xlu0 %v145_v15 }
 0x20f   :  { %170 = vadd.xlane.f32.xlu0 %v169_v17 }
 0x28b   :  { %v120_v18 = vpop.xlane.xlu1 %119  ;;  %v108_v19 = vpop.xlane.xlu0 %107 }
 0x28c   :  { %v121_v20 = vrot.slane %v120_v18, 4  ;;  %v109_v21 = vrot.slane %v108_v19, 4 }
 0x28e   :  { %v122_v22 = vadd.f32 %v121_v20, %v120_v18  ;;  %v110_v23 = vadd.f32 %v109_v21, %v108_v19 }
 0x290   :  { %v123_v24 = vrot.slane %v122_v22, 2  ;;  %v111_v25 = vrot.slane %v110_v23, 2 }
 0x292   :  { %v112_v26 = vadd.f32 %v111_v25, %v110_v23  ;;  %v124_v27 = vadd.f32 %v123_v24, %v122_v22 }
 0x294   :  { %v113_v28 = vrot.slane %v112_v26, 1  ;;  %v125_v29 = vrot.slane %v124_v27, 1 }
 0x296   :  { %v114_v30 = vadd.f32 %v113_v28, %v112_v26  ;;  %v126_v31 = vadd.f32 %v125_v29, %v124_v27 }
 0x298   :  { %v159_v32 = vpop.xlane.xlu1 %158  ;;  %231 = vpush %v114_v30  ;;  %v147_v33 = vpop.xlane.xlu0 %146 }
 0x299   :  { %v160_v34 = vrot.slane %v159_v32, 4  ;;  %233 = vpush %v126_v31  ;;  %v148_v35 = vrot.slane %v147_v33, 4 }
 0x29b   :  { %v161_v36 = vadd.f32 %v160_v34, %v159_v32  ;;  %v149_v37 = vadd.f32 %v148_v35, %v147_v33 }
 0x29c   :  { %v171_v38 = vpop.xlane.xlu0 %170 }
 0x29d   :  { %v162_v39 = vrot.slane %v161_v36, 2  ;;  %v150_v40 = vrot.slane %v149_v37, 2  ;;  %v172_v41 = vrot.slane %v171_v38, 4 }
 0x29f   :  { %v163_v42 = vadd.f32 %v162_v39, %v161_v36  ;;  %v173_v43 = vadd.f32 %v172_v41, %v171_v38  ;;  %v151_v44 = vadd.f32 %v150_v40, %v149_v37 }
 0x2a1   :  { %v174_v45 = vrot.slane %v173_v43, 2  ;;  %v152_v46 = vrot.slane %v151_v44, 1  ;;  %v164_v47 = vrot.slane %v163_v42, 1 }
 0x2a3   :  { %v175_v48 = vadd.f32 %v174_v45, %v173_v43  ;;  %v153_v49 = vadd.f32 %v152_v46, %v151_v44  ;;  %v165_v50 = vadd.f32 %v164_v47, %v163_v42 }
 0x2a5   :  { %235 = vpush %v153_v49  ;;  %v176_v51 = vrot.slane %v175_v48, 1 }
 0x2a6   :  { %237 = vpush %v165_v50 }
 0x2a7   :  { %v177_v52 = vadd.f32 %v176_v51, %v175_v48 }
 0x2a9   :  { %239 = vpush %v177_v52 }
 0x2c9   :  { %s232_s9 = spop %231 }
 0x2ca   :  { %s234_s10 = spop %233  ;;  %v116_v53 = vstv %s232_s9 }
 0x2cb   :  { %v128_v54 = vstv %s234_s10  ;;  %v180_v55 = vmul.f32 16.0, %v116_v53  ;;  %v188_v57 = vmul.f32 8.0, %v116_v53 }
 0x2cc   :  { %v189_v58 = vmul.f32 8.0, %v128_v54  ;;  %v184_v61 = vmul.f32 16.0, %v128_v54 }
 0x2ce   :  { %v190_v2 = vadd.f32 %v189_v58, %v188_v57 }
 0x2d6   :  { %s236_s11 = spop %235 }
 0x2d7   :  { %v155_v56 = vstv %s236_s11  ;;  %s238_s12 = spop %237 }
 0x2d8   :  { %v181_v59 = vmul.f32 2.0, %v155_v56  ;;  %v167_v60 = vstv %s238_s12 }
 0x2d9   :  { %v185_v62 = vmul.f32 2.0, %v167_v60 }
 0x2da   :  { %v182_v63 = vsub.f32 %v180_v55, %v181_v59  ;;  %s240_s13 = spop %239 }
 0x2db   :  { %v186_v0 = vsub.f32 %v184_v61, %v185_v62  ;;  %v179_v1 = vstv %s240_s13 }
 0x2dc   :  { %v191_v3 = vmul.f32 2.0, %v179_v1  ;;  %v183_v4 = vmul.f32 0.03125, %v182_v63 }
 0x2dd   :  { %v187_v5 = vmul.f32 0.03125, %v186_v0 }
 0x2de   :  { %v192_v6 = vsub.f32 %v190_v2, %v191_v3 }
 0x2df   :  { %v194_v8 = vadd.f32 %v187_v5, %v183_v4 }
 0x2e0   :  { %v193_v7 = vmul.f32 0.03125, %v192_v6 }
 0x2e2   :  { %v195_v9 = vmul.f32 2.0, %v193_v7 }
 0x2e4   :  { %v196_v10 = vadd.f32 %v195_v9, %v194_v8  ;;  %v199_v15 = vsub.f32 %v194_v8, %v195_v9 }
 0x2e6   :  { %v197_v11 = vmul.f32 0.004166667, %v196_v10 }
 0x2e8   :  { %v198_v12 = vmul.f32 0.25, %v197_v11 }
 0x2ea   :  { %248 = vrcp.f32 %v198_v12 }
 0x2f4   :  { %v249_v13 = vpop.eup %248 }
 0x2f5   :  { %v201_v14 = vmul.f32 1.9375, %v249_v13 }
 0x2f7   :  { %v202_v16 = vsub.f32 0.0, %v201_v14 }
 0x2f9   :  { %v203_v17 = vmul.f32 %v202_v16, %v199_v15 }
 0x2fb   :  { %v204_v18 = vmul.f32 0.015625, %v203_v17 }
 0x2fd   :  { %206 = vst.msk [vmem:[#allocation7] sm:$0x1] %vm205_vm2, %v204_v18 }
 0x2fe   :  { %305 = shalt.err (!%p302_p6)
}
 0x2ff   :  { %s306_s20 = scalar_lea.hbm %s388_s2, 16 }
 0x300   :  { %p307_p7 = scmp.ne.s32.totalorder %s388_s2, %s306_s20  ;;  %p310_p8 = scmp.lt.u32.totalorder %s306_s20, %s388_s2 }
 0x302   :  { %p312_p9 = pnand %p310_p8, %p307_p7 }
 0x304   :  { %315 = shalt.err (!%p312_p9)
}
 0x305   :  { %216 = dma.vmem_to_hbm [thread:$0]  %s214_s15, 16, %s388_s2, [#allocation4]  }
 0x306   :  { %320 = dma.done.wait [#allocation4], 16  }
 0x307   :  { %321 = vsyncadd [#allocation4], 4294967280 }
 0x308   :  { %220 = vsyncpa [#allocation3], 1 }
 0x309   :  { %221 = vsyncpa [#allocation6], 1 }
 0x30a   :  { %222 = vsyncpa [#allocation4], 1 }

</bundles_post_ra>
